<compile_context>
chip_gen: v5e
topology: v5e:2x2
jax: 0.10.0
libtpu: 0.0.40
codegen_flags: <defaults>
</compile_context>

<pallas_src>
import functools
import math

import jax
import jax.numpy as jnp
from jax.experimental import pallas as pl
from jax.experimental.pallas import tpu as pltpu


# ----------------------------------------------------------------------------
# Parameter setup (module __init__): deterministic pe buffer, same math as
# the PyTorch code (note: this module intentionally uses log(1000.0), not the
# textbook log(10000.0)).
# ----------------------------------------------------------------------------
def make_positional_encoding(d_model: int, max_len: int = 500, dtype=jnp.float32):
    if d_model % 2 != 0:
        # The PyTorch module would also fail (shape mismatch on the cos slots).
        raise ValueError("d_model must be even, got %d" % d_model)
    position = jnp.arange(max_len, dtype=jnp.float32)[:, None]            # (max_len, 1)
    div_term = jnp.exp(
        jnp.arange(0, d_model, 2, dtype=jnp.float32) * -(math.log(1000.0) / d_model)
    )                                                                     # (d_model/2,)
    pe = jnp.zeros((max_len, 1, d_model), dtype=jnp.float32)
    pe = pe.at[:, 0, 0::2].set(jnp.sin(position * div_term))
    pe = pe.at[:, 0, 1::2].set(jnp.cos(position * div_term))
    return pe.astype(dtype)                                               # (max_len, 1, d_model)


# ----------------------------------------------------------------------------
# Kernel
# ----------------------------------------------------------------------------
def _pos_enc_kernel(x_ref, pe_ref, o_ref, *, batch: int, d_model: int):
    # x_ref / o_ref: (tile_s, batch * d_model) -- lane-dense flattened block.
    # pe_ref:        (tile_s, d_model)         -- one copy per sequence row.
    pe = pe_ref[...]
    if batch == 1:
        o_ref[...] = x_ref[...] + pe
    else:
        # Broadcast pe across the batch-major lane chunks.  Each chunk is a
        # full-width unmasked add/store whenever d_model is a multiple of 128.
        for b in range(batch):
            sl = slice(b * d_model, (b + 1) * d_model)
            o_ref[:, sl] = x_ref[:, sl] + pe
    # TODO(synk): dropout p=0.0 is identity; a training-mode p>0 would need
    # pltpu.prng_seed + pltpu.stateful_bernoulli masking and 1/(1-p) scaling.


# ----------------------------------------------------------------------------
# Wrapper
# ----------------------------------------------------------------------------
_VMEM_BUDGET_BYTES = 24 * 1024 * 1024   # headroom under v7x's 32 MiB scoped VMEM
_MIN_PALLAS_BYTES = 1 << 20             # below this, let XLA fuse the add


def _choose_tile_s(S: int, B: int, D: int, itemsize: int) -> int:
    # Per pipelined step: x block + out block + pe block, each double-buffered.
    per_row = 2 * (2 * B * D + D) * itemsize
    max_rows = max(8, _VMEM_BUDGET_BYTES // per_row)
    if S <= max_rows:
        return S
    return max(8, (max_rows // 8) * 8)


def positional_encoding_forward(x: jax.Array, pe: jax.Array, *,
                                use_pallas=None, tile_s=None) -> jax.Array:
    """x: (S, B, D); pe: (max_len, 1, D).  Returns dropout_{p=0}(x + pe[:S])."""
    S, B, D = x.shape
    assert pe.ndim == 3 and pe.shape[1] == 1 and pe.shape[2] == D and pe.shape[0] >= S
    pe = pe.astype(x.dtype)

    nbytes = x.size * x.dtype.itemsize
    if use_pallas is None:
        use_pallas = nbytes >= _MIN_PALLAS_BYTES
    if not use_pallas:
        # Tiny tensors: kernel launch overhead dominates; XLA fuses this add.
        return x + pe[:S]

    # Lane-dense view: (S, B, D) -> (S, B*D); contiguous reshape, no copy.
    x2 = x.reshape(S, B * D)
    pe2 = pe.reshape(pe.shape[0], D)        # (max_len, D); no copy

    itemsize = x.dtype.itemsize
    if tile_s is None:
        tile_s = _choose_tile_s(S, B, D, itemsize)
    tile_s = min(tile_s, S)
    num_tiles = pl.cdiv(S, tile_s)

    # Pass the full pe buffer (index_map only visits the first num_tiles
    # blocks).  Corner case: a single full-S block whose row count is not a
    # multiple of 8 must equal pe's own leading dim to be a legal block.
    if tile_s == S and S % 8 != 0 and S != pe2.shape[0]:
        pe_in = pe2[:S]
    else:
        pe_in = pe2

    kernel = functools.partial(_pos_enc_kernel, batch=B, d_model=D)

    out2 = pl.pallas_call(
        kernel,
        out_shape=jax.ShapeDtypeStruct((S, B * D), x.dtype),
        grid_spec=pltpu.PrefetchScalarGridSpec(
            num_scalar_prefetch=0,
            grid=(num_tiles,),
            in_specs=[
                pl.BlockSpec((tile_s, B * D), lambda i: (i, 0)),
                pl.BlockSpec((tile_s, D), lambda i: (i, 0)),
            ],
            out_specs=pl.BlockSpec((tile_s, B * D), lambda i: (i, 0)),
        ),
        compiler_params=pltpu.CompilerParams(
            dimension_semantics=("parallel",),
            vmem_limit_bytes=32 * 1024 * 1024,
        ),
    )(x2, pe_in)

    return out2.reshape(S, B, D)


# ----------------------------------------------------------------------------
# Demo / self-check
# ----------------------------------------------------------------------------
if __name__ == "__main__":
    max_len = 500

    # Small shape consistent with the module: seq=8, batch=2, d_model=32.
    S, B, D = 8, 2, 32
    key = jax.random.PRNGKey(0)
    x = jax.random.normal(key, (S, B, D), dtype=jnp.float32)
    pe = make_positional_encoding(D, max_len=max_len, dtype=jnp.float32)

    out = positional_encoding_forward(x, pe, use_pallas=True)  # force kernel path
    out = jax.block_until_ready(out)
    ref = x + pe[:S]
    assert out.shape == (S, B, D)
    assert jnp.allclose(out, ref, atol=1e-6), "mismatch vs reference (demo shape)"

    # Also exercise the multi-tile path (partial final tile, pe block reuse).
    S2, B2, D2 = 40, 4, 128
    x2 = jax.random.normal(jax.random.PRNGKey(0), (S2, B2, D2), dtype=jnp.float32)
    pe_d2 = make_positional_encoding(D2, max_len=max_len, dtype=jnp.float32)
    out2 = positional_encoding_forward(x2, pe_d2, use_pallas=True, tile_s=16)
    out2 = jax.block_until_ready(out2)
    ref2 = x2 + pe_d2[:S2]
    assert jnp.allclose(out2, ref2, atol=1e-6), "mismatch vs reference (tiled shape)"

    print("KERNEL_OK")
</pallas_src>

<mosaic_0001>
module attributes {stable_mosaic.version = 11 : i64} {
  func.func @_pos_enc_kernel(%arg0: i32, %arg1: memref<8x64xf32, #tpu.memory_space<vmem>>, %arg2: memref<8x32xf32, #tpu.memory_space<vmem>>, %arg3: memref<8x64xf32, #tpu.memory_space<vmem>>) attributes {dimension_semantics = [#tpu.dimension_semantics<parallel>], iteration_bounds = array<i64: 1>, scalar_prefetch = 0 : i64, scratch_operands = 0 : i64, tpu.core_type = #tpu.core_type<tc>, window_params = [{transform_indices = @transform_0, window_bounds = array<i64: 8, 64>}, {transform_indices = @transform_1, window_bounds = array<i64: 8, 32>}, {transform_indices = @transform_2, window_bounds = array<i64: 8, 64>}]} {
    %c0 = arith.constant 0 : index
    %c0_0 = arith.constant 0 : index
    %0 = vector.load %arg2[%c0, %c0_0] : memref<8x32xf32, #tpu.memory_space<vmem>>, vector<8x32xf32>
    %c0_1 = arith.constant 0 : index
    %c0_2 = arith.constant 0 : index
    %1 = vector.load %arg1[%c0_1, %c0_2] : memref<8x64xf32, #tpu.memory_space<vmem>>, vector<8x32xf32>
    %2 = arith.addf %1, %0 : vector<8x32xf32>
    %c0_3 = arith.constant 0 : index
    %c0_4 = arith.constant 0 : index
    %3 = vector.load %arg3[%c0_3, %c0_4] : memref<8x64xf32, #tpu.memory_space<vmem>>, vector<8x32xf32>
    tpu.vector_store %arg3[%c0_3, %c0_4], %2 {strides = array<i32>} : memref<8x64xf32, #tpu.memory_space<vmem>>, vector<8x32xf32>,
    %c0_5 = arith.constant 0 : index
    %c32 = arith.constant 32 : index
    %4 = vector.load %arg1[%c0_5, %c32] : memref<8x64xf32, #tpu.memory_space<vmem>>, vector<8x32xf32>
    %5 = arith.addf %4, %0 : vector<8x32xf32>
    %c0_6 = arith.constant 0 : index
    %c32_7 = arith.constant 32 : index
    %6 = vector.load %arg3[%c0_6, %c32_7] : memref<8x64xf32, #tpu.memory_space<vmem>>, vector<8x32xf32>
    tpu.vector_store %arg3[%c0_6, %c32_7], %5 {strides = array<i32>} : memref<8x64xf32, #tpu.memory_space<vmem>>, vector<8x32xf32>,
    return
  }
  func.func @transform_0(%arg0: i32) -> (i32, i32) {
    %c0_i32 = arith.constant 0 : i32
    %c0_i32_0 = arith.constant 0 : i32
    return %arg0, %c0_i32 : i32, i32
  }
  func.func @transform_1(%arg0: i32) -> (i32, i32) {
    %c0_i32 = arith.constant 0 : i32
    %c0_i32_0 = arith.constant 0 : i32
    return %arg0, %c0_i32 : i32, i32
  }
  func.func @transform_2(%arg0: i32) -> (i32, i32) {
    %c0_i32 = arith.constant 0 : i32
    %c0_i32_0 = arith.constant 0 : i32
    return %arg0, %c0_i32 : i32, i32
  }
}

</mosaic_0001>

<bundles_post_ra>
// kernel: tpu_custom_call.1
= control target key start
LH: loop header
LB: loop body
LE: loop exit
PB: predicated region body
PF: predicated region fallthrough
CT: control target
= control target key end

     0   :  { %vm15_vm0 = vcmask 261120   ;;  %s95_s0 = inlined_call_operand.vmem [shape: f32[8,64], index: 0, kind: input, shape index: {}]   ;;  %s96_s1 = inlined_call_operand.vmem [shape: f32[500,32], index: 1, kind: input, shape index: {}]   ;;  %s97_s2 = inlined_call_operand.hbm [shape: f32[8,64], index: 2, kind: output, shape index: {}]  }
   0x1   :  { %v12_v0 = vld [vmem:[%s96_s1] sm:$0xff] }
   0x2   :  { %v13_v1 = vld [vmem:[%s95_s0] sm:$0xff] }
   0x3   :  { %7 = vsyncpa [#allocation3], 0  ;;  %v14_v2 = vadd.f32 %v13_v1, %v12_v0  ;;  %s69_s13 = smov 32   ;;  %s70_s14 = smov [#allocation2]   ;;  %vm23_vm1 = vcmask 523520  }
   0x4   :  { %19 = vrot.lane.b32.xlu0 %v12_v0, %s69_s13  ;;  %s30_s15 = sshll.u32 %s70_s14, 4  ;;  %s32_s18 = sshll.u32 %s97_s2, 4  ;;  %s31_s15 = int_to_ptr.vmem [resolvable:$true] %s30_s15  ;;  %s33_s18 = int_to_ptr.hbm [resolvable:$true] %s32_s18 }
   0x5   :  { %16 = vst.msk [vmem:[#allocation2] sm:$0xff] %vm15_vm0, %v14_v2 }
  0x76   :  { %v20_v3 = vpop.permute.xlu0 %19 }
  0x77   :  { %v22_v4 = vadd.f32 %v20_v3, %v13_v1 }
  0x79   :  { %24 = vst.msk [vmem:[#allocation2] sm:$0xff] %vm23_vm1, %v22_v4 }
  0x7a   :  { %35 = dma.vmem_to_hbm [thread:$0]  %s31_s15, 128, %s33_s18, [#allocation3]  }
  0x7b   :  { %67 = dma.done.wait [#allocation3], 128  }
  0x7c   :  { %68 = vsyncadd [#allocation3], 4294967168 }
  0x7d   :  { %40 = vsyncpa [#allocation3], 1 }

</bundles_post_ra>
